<compile_context>
chip_gen: v5e
topology: v5e:2x2
jax: 0.10.0
libtpu: 0.0.40
codegen_flags: <defaults>
</compile_context>

<pallas_src>
from functools import partial

import jax
import jax.numpy as jnp
import numpy as np
from jax.experimental import pallas as pl
from jax.experimental.pallas import tpu as pltpu


# ----------------------------- Pallas kernel -----------------------------

def _cal_fused_kernel(x_ref, ac_ref, ao_ref, wc_ref, wo_ref, p_ref, out_ref):
    x = x_ref[...]                                    # [N, H] f32
    n, h = x.shape
    p = p_ref[...]                                    # [8, H] f32 packed-param slab
    gamma_c, beta_c, bias_c = p[0:1, :], p[1:2, :], p[2:3, :]
    gamma_o, beta_o, bias_o = p[3:4, :], p[4:5, :], p[5:6, :]
    wn_d = p[6:7, :]                                  # Wn[:,1] - Wn[:,0]
    bn_d = p[7:8, 0:1]                                # bn[0,1] - bn[0,0]

    # node attention: 2-class softmax == sigmoid of the logit difference (EUP, no 2-wide reduce)
    na1 = 1.0 / (1.0 + jnp.exp(-(jnp.sum(x * wn_d, axis=-1, keepdims=True) + bn_d)))
    na0 = 1.0 - na1                                   # node_att[:, 0]

    inv_h = 1.0 / h

    def branch(att, gamma, beta, w, a, bias):
        v = att * x                                                        # [N, H]
        # BatchNorm1d (training mode): batch statistics, biased variance, eps=1e-5
        # TODO(synk): if the node batch is ever row-tiled, make these a separate global
        # two-pass reduction so tiling does not silently change BN semantics.
        mu = jnp.mean(v, axis=0, keepdims=True)
        var = jnp.mean((v - mu) * (v - mu), axis=0, keepdims=True)
        vbn = (v - mu) * jax.lax.rsqrt(var + 1e-5) * gamma + beta
        xw = jnp.dot(vbn.astype(jnp.bfloat16), w,
                     preferred_element_type=jnp.float32)                   # [N, H] f32
        conv = jnp.dot(a, xw.astype(jnp.bfloat16),
                       preferred_element_type=jnp.float32)                 # [N, H] f32
        conv = jnp.maximum(conv + bias, 0.0)                               # bias + ReLU epilogue
        return jnp.sum(conv, axis=-1, keepdims=True) * inv_h               # AdaptiveAvgPool1d(1)

    xc_pool = branch(na0, gamma_c, beta_c, wc_ref[...], ac_ref[...], bias_c)
    xo_pool = branch(na1, gamma_o, beta_o, wo_ref[...], ao_ref[...], bias_o)
    xco = xc_pool + xo_pool            # with_random=False (identity shuffle), cat_or_add='add'

    # single lane-dense output slab (one unmasked writeback); lanes 0..3 carry data, rest are 0
    lane = jax.lax.broadcasted_iota(jnp.int32, out_ref.shape, 1)
    out = jnp.where(lane == 0, na1, 0.0)
    out = jnp.where(lane == 1, xc_pool, out)
    out = jnp.where(lane == 2, xo_pool, out)
    out = jnp.where(lane == 3, xco, out)
    out_ref[...] = out


def cal_node_fused(x, a_c, a_o, w_c, w_o, pslab):
    # TODO(synk): for large N, tile over row panels (grid over N with
    # dimension_semantics=('parallel', ...) so both v7x TensorCores are used; size the A row
    # panel for v7x's 64 MiB VMEM, target >=256-row M panels on v6e / 128-256 on v5e, and
    # raise pipeline depth on the A stream only if the DMA is still exposed). At this toy
    # size a single full-array block is optimal.
    n, h = x.shape
    return pl.pallas_call(
        _cal_fused_kernel,
        grid=(1,),
        in_specs=[
            pl.BlockSpec((n, h), lambda i: (0, 0)),      # x              f32
            pl.BlockSpec((n, n), lambda i: (0, 0)),      # A_c normalized bf16
            pl.BlockSpec((n, n), lambda i: (0, 0)),      # A_o normalized bf16
            pl.BlockSpec((h, h), lambda i: (0, 0)),      # Wc             bf16
            pl.BlockSpec((h, h), lambda i: (0, 0)),      # Wo             bf16
            pl.BlockSpec((8, h), lambda i: (0, 0)),      # packed params  f32
        ],
        out_specs=pl.BlockSpec((n, 128), lambda i: (0, 0)),
        out_shape=jax.ShapeDtypeStruct((n, 128), jnp.float32),
        compiler_params=pltpu.CompilerParams(dimension_semantics=("arbitrary",)),
    )(x, a_c, a_o, w_c, w_o, pslab)


# ----------------------------- glue (plain JAX) ----------------------------

def prepare_params(params):
    """One-time packing of the module's small parameters (kept out of the per-call hot path)."""
    h = params["Wc"].shape[0]
    pslab = jnp.zeros((8, h), jnp.float32)
    pslab = pslab.at[0].set(params["gamma_c"][0])
    pslab = pslab.at[1].set(params["beta_c"][0])
    pslab = pslab.at[2].set(params["bc"][0])
    pslab = pslab.at[3].set(params["gamma_o"][0])
    pslab = pslab.at[4].set(params["beta_o"][0])
    pslab = pslab.at[5].set(params["bo"][0])
    pslab = pslab.at[6].set(params["Wn"][:, 1] - params["Wn"][:, 0])
    pslab = pslab.at[7, 0].set(params["bn"][0, 1] - params["bn"][0, 0])
    we_d = params["We"][:, 1] - params["We"][:, 0]              # [2H]
    we2 = jnp.stack([we_d[:h], we_d[h:]], axis=1)               # [H, 2]: one matmul for edge logits
    return {
        "pslab": pslab,
        "wc": params["Wc"].astype(jnp.bfloat16),
        "wo": params["Wo"].astype(jnp.bfloat16),
        "we2": we2,
        "be_d": params["be"][0, 1] - params["be"][0, 0],
    }


def build_norm_adj_pair(edge_index, ew_c, ew_o, num_nodes):
    """Dense symmetric-normalized adjacencies A[target, source] with self-loops (weight 1).

    TODO(synk): for sparse/large graphs skip the O(N^2) dense build entirely: pass
    (row, col, norm_c, norm_o) to the kernel via PrefetchScalarGridSpec and gather/accumulate
    rows of XW inside the kernel; on v7x the dense A could also be stored in fp8 (e4m3) to
    halve the HBM stream of the aggregation matmul.
    """
    row, col = edge_index[0], edge_index[1]
    loop = jnp.arange(num_nodes, dtype=row.dtype)
    rows = jnp.concatenate([row, loop])
    cols = jnp.concatenate([col, loop])
    ones = jnp.ones((num_nodes,), jnp.float32)

    def norm_adj(ew):
        ew = jnp.concatenate([ew, ones])
        deg = jnp.zeros((num_nodes,), ew.dtype).at[rows].add(ew)
        dinv = jnp.where(deg > 0, jax.lax.rsqrt(deg), 0.0)
        nrm = dinv[rows] * ew * dinv[cols]
        # aggregation: out[col] += norm * (x @ W)[row]  ->  A[col, row] += norm
        return jnp.zeros((num_nodes, num_nodes), jnp.float32).at[cols, rows].add(nrm)

    return norm_adj(ew_c).astype(jnp.bfloat16), norm_adj(ew_o).astype(jnp.bfloat16)


@partial(jax.jit, static_argnums=(3,))
def cal_forward(x, edge_index, prepped, batch_size):
    n = x.shape[0]
    row, col = edge_index[0], edge_index[1]

    # edge attention without materializing [E, 2H]: 2-class softmax == sigmoid of the logit
    # difference; a single [N,H]@[H,2] matmul gives both source and target contributions.
    d = x @ prepped["we2"]                                        # [N, 2]
    ew_o = jax.nn.sigmoid(d[row, 0] + d[col, 1] + prepped["be_d"])  # edge_att[:, 1]
    ew_c = 1.0 - ew_o                                             # edge_att[:, 0]

    a_c, a_o = build_norm_adj_pair(edge_index, ew_c, ew_o, n)     # [N, N] bf16 each

    out = cal_node_fused(x, a_c, a_o, prepped["wc"], prepped["wo"], prepped["pslab"])
    na_o = out[:, 0]
    xc_pool = out[:, 1:2]
    xo_pool = out[:, 2:3]
    xco = out[:, 3:4]
    return (xo_pool.reshape(batch_size, -1),
            xc_pool.reshape(batch_size, -1),
            xco.reshape(batch_size, -1),
            na_o)


# ----------------------------- reference (pure JAX, f32) --------------------

def build_norm_adj(edge_index, edge_weight, num_nodes):
    row, col = edge_index[0], edge_index[1]
    loop = jnp.arange(num_nodes, dtype=row.dtype)
    row = jnp.concatenate([row, loop])
    col = jnp.concatenate([col, loop])
    ew = jnp.concatenate([edge_weight, jnp.ones((num_nodes,), edge_weight.dtype)])
    deg = jnp.zeros((num_nodes,), ew.dtype).at[row].add(ew)
    dinv = jnp.where(deg > 0, jax.lax.rsqrt(deg), 0.0)
    norm = dinv[row] * ew * dinv[col]
    return jnp.zeros((num_nodes, num_nodes), ew.dtype).at[col, row].add(norm)


def cal_reference(x, edge_index, params, batch_size):
    row, col = edge_index[0], edge_index[1]
    edge_rep = jnp.concatenate([x[row], x[col]], axis=-1)
    edge_att = jax.nn.softmax(edge_rep @ params["We"] + params["be"], axis=-1)
    na = jax.nn.softmax(x @ params["Wn"] + params["bn"], axis=-1)
    xc = na[:, 0:1] * x
    xo = na[:, 1:2] * x

    def bn(v, g, b):
        mu = v.mean(0, keepdims=True)
        var = ((v - mu) ** 2).mean(0, keepdims=True)
        return (v - mu) / jnp.sqrt(var + 1e-5) * g + b

    n = x.shape[0]
    ac = build_norm_adj(edge_index, edge_att[:, 0], n)
    ao = build_norm_adj(edge_index, edge_att[:, 1], n)
    xc_c = jnp.maximum(ac @ (bn(xc, params["gamma_c"], params["beta_c"]) @ params["Wc"]) + params["bc"], 0.0)
    xo_c = jnp.maximum(ao @ (bn(xo, params["gamma_o"], params["beta_o"]) @ params["Wo"]) + params["bo"], 0.0)
    xc_p = xc_c.mean(-1, keepdims=True)
    xo_p = xo_c.mean(-1, keepdims=True)
    xco = xc_p + xo_p
    return (xo_p.reshape(batch_size, -1), xc_p.reshape(batch_size, -1),
            xco.reshape(batch_size, -1), na[:, 1])


# ----------------------------- main -----------------------------------------

if __name__ == "__main__":
    batch_size = 2
    cline_dim = 8
    hidden = 32
    N = batch_size * cline_dim
    E = 24

    key = jax.random.PRNGKey(0)
    ks = jax.random.split(key, 10)

    x = jax.random.normal(ks[0], (N, hidden), dtype=jnp.float32)

    # random directed edges, no self-loops
    row = jax.random.randint(ks[1], (E,), 0, N)
    col = jax.random.randint(ks[2], (E,), 0, N)
    col = jnp.where(col == row, (col + 1) % N, col)
    edge_index = jnp.stack([row, col]).astype(jnp.int32)

    # deterministic parameter init (shapes from the module's __init__)
    k_e = 1.0 / np.sqrt(2 * hidden)
    k_n = 1.0 / np.sqrt(hidden)
    glorot = np.sqrt(6.0 / (hidden + hidden))
    params = {
        "We": jax.random.uniform(ks[3], (2 * hidden, 2), jnp.float32, -k_e, k_e),   # edge_att_mlp
        "be": jax.random.uniform(ks[4], (1, 2), jnp.float32, -k_e, k_e),
        "Wn": jax.random.uniform(ks[5], (hidden, 2), jnp.float32, -k_n, k_n),       # node_att_mlp
        "bn": jax.random.uniform(ks[6], (1, 2), jnp.float32, -k_n, k_n),
        "gamma_c": jnp.ones((1, hidden), jnp.float32),                              # bnc
        "beta_c": jnp.zeros((1, hidden), jnp.float32),
        "gamma_o": jnp.ones((1, hidden), jnp.float32),                              # bno
        "beta_o": jnp.zeros((1, hidden), jnp.float32),
        "Wc": jax.random.uniform(ks[7], (hidden, hidden), jnp.float32, -glorot, glorot),  # context_convs
        "bc": jnp.zeros((1, hidden), jnp.float32),
        "Wo": jax.random.uniform(ks[8], (hidden, hidden), jnp.float32, -glorot, glorot),  # objects_convs
        "bo": jnp.zeros((1, hidden), jnp.float32),
    }

    prepped = prepare_params(params)        # one-time packing, outside the hot path

    out = cal_forward(x, edge_index, prepped, batch_size)
    out = jax.block_until_ready(out)

    ref = cal_reference(x, edge_index, params, batch_size)
    for o, r in zip(out, ref):
        np.testing.assert_allclose(np.asarray(o), np.asarray(r), rtol=2e-2, atol=2e-2)

    print("KERNEL_OK")
</pallas_src>

<mosaic_0001>
module attributes {stable_mosaic.version = 11 : i64} {
  func.func @_cal_fused_kernel(%arg0: i32, %arg1: memref<16x32xf32, #tpu.memory_space<vmem>>, %arg2: memref<16x16xbf16, #tpu.memory_space<vmem>>, %arg3: memref<16x16xbf16, #tpu.memory_space<vmem>>, %arg4: memref<32x32xbf16, #tpu.memory_space<vmem>>, %arg5: memref<32x32xbf16, #tpu.memory_space<vmem>>, %arg6: memref<8x32xf32, #tpu.memory_space<vmem>>, %arg7: memref<16x128xf32, #tpu.memory_space<vmem>>) attributes {dimension_semantics = [#tpu.dimension_semantics<arbitrary>], iteration_bounds = array<i64: 1>, scalar_prefetch = 0 : i64, scratch_operands = 0 : i64, tpu.core_type = #tpu.core_type<tc>, window_params = [{pipeline_mode = #tpu.pipeline_mode<synchronous>, transform_indices = @transform_0, window_bounds = array<i64: 16, 32>}, {pipeline_mode = #tpu.pipeline_mode<synchronous>, transform_indices = @transform_1, window_bounds = array<i64: 16, 16>}, {pipeline_mode = #tpu.pipeline_mode<synchronous>, transform_indices = @transform_2, window_bounds = array<i64: 16, 16>}, {pipeline_mode = #tpu.pipeline_mode<synchronous>, transform_indices = @transform_3, window_bounds = array<i64: 32, 32>}, {pipeline_mode = #tpu.pipeline_mode<synchronous>, transform_indices = @transform_4, window_bounds = array<i64: 32, 32>}, {pipeline_mode = #tpu.pipeline_mode<synchronous>, transform_indices = @transform_5, window_bounds = array<i64: 8, 32>}, {pipeline_mode = #tpu.pipeline_mode<synchronous>, transform_indices = @transform_6, window_bounds = array<i64: 16, 128>}]} {
    %c0 = arith.constant 0 : index
    %c0_0 = arith.constant 0 : index
    %0 = vector.load %arg1[%c0, %c0_0] : memref<16x32xf32, #tpu.memory_space<vmem>>, vector<16x32xf32>
    %c0_1 = arith.constant 0 : index
    %c0_2 = arith.constant 0 : index
    %1 = vector.load %arg6[%c0_1, %c0_2] : memref<8x32xf32, #tpu.memory_space<vmem>>, vector<8x32xf32>
    %2 = vector.extract_strided_slice %1 {offsets = [0, 0], sizes = [1, 32], strides = [1, 1]} : vector<8x32xf32> to vector<1x32xf32>
    %3 = vector.extract_strided_slice %1 {offsets = [1, 0], sizes = [1, 32], strides = [1, 1]} : vector<8x32xf32> to vector<1x32xf32>
    %4 = vector.extract_strided_slice %1 {offsets = [2, 0], sizes = [1, 32], strides = [1, 1]} : vector<8x32xf32> to vector<1x32xf32>
    %5 = vector.extract_strided_slice %1 {offsets = [3, 0], sizes = [1, 32], strides = [1, 1]} : vector<8x32xf32> to vector<1x32xf32>
    %6 = vector.extract_strided_slice %1 {offsets = [4, 0], sizes = [1, 32], strides = [1, 1]} : vector<8x32xf32> to vector<1x32xf32>
    %7 = vector.extract_strided_slice %1 {offsets = [5, 0], sizes = [1, 32], strides = [1, 1]} : vector<8x32xf32> to vector<1x32xf32>
    %8 = vector.extract_strided_slice %1 {offsets = [6, 0], sizes = [1, 32], strides = [1, 1]} : vector<8x32xf32> to vector<1x32xf32>
    %9 = vector.extract_strided_slice %1 {offsets = [7, 0], sizes = [1, 1], strides = [1, 1]} : vector<8x32xf32> to vector<1x1xf32>
    %10 = vector.broadcast %8 : vector<1x32xf32> to vector<16x32xf32>
    %11 = arith.mulf %0, %10 : vector<16x32xf32>
    %cst = arith.constant dense<0.000000e+00> : vector<16xf32>
    %12 = vector.multi_reduction <add>, %11, %cst [1] : vector<16x32xf32> to vector<16xf32>
    %13 = vector.shape_cast %12 : vector<16xf32> to vector<16x1xf32>
    %14 = vector.broadcast %9 : vector<1x1xf32> to vector<16x1xf32>
    %15 = arith.addf %13, %14 : vector<16x1xf32>
    %cst_3 = arith.constant 0.000000e+00 : f32
    %16 = vector.broadcast %cst_3 : f32 to vector<16x1xf32>
    %17 = arith.subf %16, %15 : vector<16x1xf32>
    %18 = math.exp %17 : vector<16x1xf32>
    %cst_4 = arith.constant 1.000000e+00 : f32
    %19 = vector.broadcast %cst_4 : f32 to vector<16x1xf32>
    %20 = arith.addf %19, %18 : vector<16x1xf32>
    %cst_5 = arith.constant 1.000000e+00 : f32
    %21 = vector.broadcast %cst_5 : f32 to vector<16x1xf32>
    %22 = arith.divf %21, %20 : vector<16x1xf32>
    %cst_6 = arith.constant 1.000000e+00 : f32
    %23 = vector.broadcast %cst_6 : f32 to vector<16x1xf32>
    %24 = arith.subf %23, %22 : vector<16x1xf32>
    %c0_7 = arith.constant 0 : index
    %c0_8 = arith.constant 0 : index
    %25 = vector.load %arg4[%c0_7, %c0_8] : memref<32x32xbf16, #tpu.memory_space<vmem>>, vector<32x32xbf16>
    %c0_9 = arith.constant 0 : index
    %c0_10 = arith.constant 0 : index
    %26 = vector.load %arg2[%c0_9, %c0_10] : memref<16x16xbf16, #tpu.memory_space<vmem>>, vector<16x16xbf16>
    %27 = vector.broadcast %24 : vector<16x1xf32> to vector<16x32xf32>
    %28 = arith.mulf %27, %0 : vector<16x32xf32>
    %cst_11 = arith.constant dense<0.000000e+00> : vector<32xf32>
    %29 = vector.multi_reduction <add>, %28, %cst_11 [0] : vector<16x32xf32> to vector<32xf32>
    %30 = vector.shape_cast %29 : vector<32xf32> to vector<1x32xf32>
    %cst_12 = arith.constant 1.600000e+01 : f32
    %31 = vector.broadcast %cst_12 : f32 to vector<1x32xf32>
    %32 = arith.divf %30, %31 : vector<1x32xf32>
    %33 = vector.broadcast %32 : vector<1x32xf32> to vector<16x32xf32>
    %34 = arith.subf %28, %33 : vector<16x32xf32>
    %35 = vector.broadcast %32 : vector<1x32xf32> to vector<16x32xf32>
    %36 = arith.subf %28, %35 : vector<16x32xf32>
    %37 = arith.mulf %34, %36 : vector<16x32xf32>
    %cst_13 = arith.constant dense<0.000000e+00> : vector<32xf32>
    %38 = vector.multi_reduction <add>, %37, %cst_13 [0] : vector<16x32xf32> to vector<32xf32>
    %39 = vector.shape_cast %38 : vector<32xf32> to vector<1x32xf32>
    %cst_14 = arith.constant 1.600000e+01 : f32
    %40 = vector.broadcast %cst_14 : f32 to vector<1x32xf32>
    %41 = arith.divf %39, %40 : vector<1x32xf32>
    %42 = vector.broadcast %32 : vector<1x32xf32> to vector<16x32xf32>
    %43 = arith.subf %28, %42 : vector<16x32xf32>
    %cst_15 = arith.constant 9.99999974E-6 : f32
    %44 = vector.broadcast %cst_15 : f32 to vector<1x32xf32>
    %45 = arith.addf %41, %44 : vector<1x32xf32>
    %46 = math.rsqrt %45 : vector<1x32xf32>
    %47 = vector.broadcast %46 : vector<1x32xf32> to vector<16x32xf32>
    %48 = arith.mulf %43, %47 : vector<16x32xf32>
    %49 = vector.broadcast %2 : vector<1x32xf32> to vector<16x32xf32>
    %50 = arith.mulf %48, %49 : vector<16x32xf32>
    %51 = vector.broadcast %3 : vector<1x32xf32> to vector<16x32xf32>
    %52 = arith.addf %50, %51 : vector<16x32xf32>
    %53 = arith.truncf %52 : vector<16x32xf32> to vector<16x32xbf16>
    %cst_16 = arith.constant dense<0.000000e+00> : vector<16x32xf32>
    %54 = tpu.matmul %53, %25, %cst_16 {dimension_numbers = #tpu.dot_dimension_numbers<[1], [0], [0], [1], [0, 0, 1, 1], [], []>} : vector<16x32xbf16>, vector<32x32xbf16>, vector<16x32xf32> -> vector<16x32xf32>
    %55 = arith.truncf %54 : vector<16x32xf32> to vector<16x32xbf16>
    %cst_17 = arith.constant dense<0.000000e+00> : vector<16x32xf32>
    %56 = tpu.matmul %26, %55, %cst_17 {dimension_numbers = #tpu.dot_dimension_numbers<[1], [0], [0], [1], [0, 0, 1, 1], [], []>} : vector<16x16xbf16>, vector<16x32xbf16>, vector<16x32xf32> -> vector<16x32xf32>
    %57 = vector.broadcast %4 : vector<1x32xf32> to vector<16x32xf32>
    %58 = arith.addf %56, %57 : vector<16x32xf32>
    %cst_18 = arith.constant 0.000000e+00 : f32
    %59 = vector.broadcast %cst_18 : f32 to vector<16x32xf32>
    %60 = arith.maximumf %58, %59 : vector<16x32xf32>
    %cst_19 = arith.constant dense<0.000000e+00> : vector<16xf32>
    %61 = vector.multi_reduction <add>, %60, %cst_19 [1] : vector<16x32xf32> to vector<16xf32>
    %62 = vector.shape_cast %61 : vector<16xf32> to vector<16x1xf32>
    %cst_20 = arith.constant 3.125000e-02 : f32
    %63 = vector.broadcast %cst_20 : f32 to vector<16x1xf32>
    %64 = arith.mulf %62, %63 : vector<16x1xf32>
    %c0_21 = arith.constant 0 : index
    %c0_22 = arith.constant 0 : index
    %65 = vector.load %arg5[%c0_21, %c0_22] : memref<32x32xbf16, #tpu.memory_space<vmem>>, vector<32x32xbf16>
    %c0_23 = arith.constant 0 : index
    %c0_24 = arith.constant 0 : index
    %66 = vector.load %arg3[%c0_23, %c0_24] : memref<16x16xbf16, #tpu.memory_space<vmem>>, vector<16x16xbf16>
    %67 = vector.broadcast %22 : vector<16x1xf32> to vector<16x32xf32>
    %68 = arith.mulf %67, %0 : vector<16x32xf32>
    %cst_25 = arith.constant dense<0.000000e+00> : vector<32xf32>
    %69 = vector.multi_reduction <add>, %68, %cst_25 [0] : vector<16x32xf32> to vector<32xf32>
    %70 = vector.shape_cast %69 : vector<32xf32> to vector<1x32xf32>
    %cst_26 = arith.constant 1.600000e+01 : f32
    %71 = vector.broadcast %cst_26 : f32 to vector<1x32xf32>
    %72 = arith.divf %70, %71 : vector<1x32xf32>
    %73 = vector.broadcast %72 : vector<1x32xf32> to vector<16x32xf32>
    %74 = arith.subf %68, %73 : vector<16x32xf32>
    %75 = vector.broadcast %72 : vector<1x32xf32> to vector<16x32xf32>
    %76 = arith.subf %68, %75 : vector<16x32xf32>
    %77 = arith.mulf %74, %76 : vector<16x32xf32>
    %cst_27 = arith.constant dense<0.000000e+00> : vector<32xf32>
    %78 = vector.multi_reduction <add>, %77, %cst_27 [0] : vector<16x32xf32> to vector<32xf32>
    %79 = vector.shape_cast %78 : vector<32xf32> to vector<1x32xf32>
    %cst_28 = arith.constant 1.600000e+01 : f32
    %80 = vector.broadcast %cst_28 : f32 to vector<1x32xf32>
    %81 = arith.divf %79, %80 : vector<1x32xf32>
    %82 = vector.broadcast %72 : vector<1x32xf32> to vector<16x32xf32>
    %83 = arith.subf %68, %82 : vector<16x32xf32>
    %cst_29 = arith.constant 9.99999974E-6 : f32
    %84 = vector.broadcast %cst_29 : f32 to vector<1x32xf32>
    %85 = arith.addf %81, %84 : vector<1x32xf32>
    %86 = math.rsqrt %85 : vector<1x32xf32>
    %87 = vector.broadcast %86 : vector<1x32xf32> to vector<16x32xf32>
    %88 = arith.mulf %83, %87 : vector<16x32xf32>
    %89 = vector.broadcast %5 : vector<1x32xf32> to vector<16x32xf32>
    %90 = arith.mulf %88, %89 : vector<16x32xf32>
    %91 = vector.broadcast %6 : vector<1x32xf32> to vector<16x32xf32>
    %92 = arith.addf %90, %91 : vector<16x32xf32>
    %93 = arith.truncf %92 : vector<16x32xf32> to vector<16x32xbf16>
    %cst_30 = arith.constant dense<0.000000e+00> : vector<16x32xf32>
    %94 = tpu.matmul %93, %65, %cst_30 {dimension_numbers = #tpu.dot_dimension_numbers<[1], [0], [0], [1], [0, 0, 1, 1], [], []>} : vector<16x32xbf16>, vector<32x32xbf16>, vector<16x32xf32> -> vector<16x32xf32>
    %95 = arith.truncf %94 : vector<16x32xf32> to vector<16x32xbf16>
    %cst_31 = arith.constant dense<0.000000e+00> : vector<16x32xf32>
    %96 = tpu.matmul %66, %95, %cst_31 {dimension_numbers = #tpu.dot_dimension_numbers<[1], [0], [0], [1], [0, 0, 1, 1], [], []>} : vector<16x16xbf16>, vector<16x32xbf16>, vector<16x32xf32> -> vector<16x32xf32>
    %97 = vector.broadcast %7 : vector<1x32xf32> to vector<16x32xf32>
    %98 = arith.addf %96, %97 : vector<16x32xf32>
    %cst_32 = arith.constant 0.000000e+00 : f32
    %99 = vector.broadcast %cst_32 : f32 to vector<16x32xf32>
    %100 = arith.maximumf %98, %99 : vector<16x32xf32>
    %cst_33 = arith.constant dense<0.000000e+00> : vector<16xf32>
    %101 = vector.multi_reduction <add>, %100, %cst_33 [1] : vector<16x32xf32> to vector<16xf32>
    %102 = vector.shape_cast %101 : vector<16xf32> to vector<16x1xf32>
    %cst_34 = arith.constant 3.125000e-02 : f32
    %103 = vector.broadcast %cst_34 : f32 to vector<16x1xf32>
    %104 = arith.mulf %102, %103 : vector<16x1xf32>
    %105 = arith.addf %64, %104 : vector<16x1xf32>
    %106 = tpu.iota {dimensions = array<i32: 1>} : vector<16x128xi32>
    %c0_i32 = arith.constant 0 : i32
    %107 = vector.broadcast %c0_i32 : i32 to vector<16x128xi32>
    %108 = arith.cmpi eq, %106, %107 : vector<16x128xi32>
    %cst_35 = arith.constant 0.000000e+00 : f32
    %109 = vector.shape_cast %22 : vector<16x1xf32> to vector<16x1xf32>
    %110 = vector.broadcast %109 : vector<16x1xf32> to vector<16x128xf32>
    %111 = vector.broadcast %cst_35 : f32 to vector<16x128xf32>
    %112 = arith.select %108, %110, %111 : vector<16x128xi1>, vector<16x128xf32>
    %c1_i32 = arith.constant 1 : i32
    %113 = vector.broadcast %c1_i32 : i32 to vector<16x128xi32>
    %114 = arith.cmpi eq, %106, %113 : vector<16x128xi32>
    %115 = vector.shape_cast %64 : vector<16x1xf32> to vector<16x1xf32>
    %116 = vector.broadcast %115 : vector<16x1xf32> to vector<16x128xf32>
    %117 = arith.select %114, %116, %112 : vector<16x128xi1>, vector<16x128xf32>
    %c2_i32 = arith.constant 2 : i32
    %118 = vector.broadcast %c2_i32 : i32 to vector<16x128xi32>
    %119 = arith.cmpi eq, %106, %118 : vector<16x128xi32>
    %120 = vector.shape_cast %104 : vector<16x1xf32> to vector<16x1xf32>
    %121 = vector.broadcast %120 : vector<16x1xf32> to vector<16x128xf32>
    %122 = arith.select %119, %121, %117 : vector<16x128xi1>, vector<16x128xf32>
    %c3_i32 = arith.constant 3 : i32
    %123 = vector.broadcast %c3_i32 : i32 to vector<16x128xi32>
    %124 = arith.cmpi eq, %106, %123 : vector<16x128xi32>
    %125 = vector.shape_cast %105 : vector<16x1xf32> to vector<16x1xf32>
    %126 = vector.broadcast %125 : vector<16x1xf32> to vector<16x128xf32>
    %127 = arith.select %124, %126, %122 : vector<16x128xi1>, vector<16x128xf32>
    %c0_36 = arith.constant 0 : index
    %c0_37 = arith.constant 0 : index
    %128 = vector.load %arg7[%c0_36, %c0_37] : memref<16x128xf32, #tpu.memory_space<vmem>>, vector<16x128xf32>
    tpu.vector_store %arg7[%c0_36, %c0_37], %127 {strides = array<i32>} : memref<16x128xf32, #tpu.memory_space<vmem>>, vector<16x128xf32>,
    return
  }
  func.func @transform_0(%arg0: i32) -> (i32, i32) {
    %c0_i32 = arith.constant 0 : i32
    %c0_i32_0 = arith.constant 0 : i32
    %c0_i32_1 = arith.constant 0 : i32
    return %c0_i32, %c0_i32_0 : i32, i32
  }
  func.func @transform_1(%arg0: i32) -> (i32, i32) {
    %c0_i32 = arith.constant 0 : i32
    %c0_i32_0 = arith.constant 0 : i32
    %c0_i32_1 = arith.constant 0 : i32
    return %c0_i32, %c0_i32_0 : i32, i32
  }
  func.func @transform_2(%arg0: i32) -> (i32, i32) {
    %c0_i32 = arith.constant 0 : i32
    %c0_i32_0 = arith.constant 0 : i32
    %c0_i32_1 = arith.constant 0 : i32
    return %c0_i32, %c0_i32_0 : i32, i32
  }
  func.func @transform_3(%arg0: i32) -> (i32, i32) {
    %c0_i32 = arith.constant 0 : i32
    %c0_i32_0 = arith.constant 0 : i32
    %c0_i32_1 = arith.constant 0 : i32
    return %c0_i32, %c0_i32_0 : i32, i32
  }
  func.func @transform_4(%arg0: i32) -> (i32, i32) {
    %c0_i32 = arith.constant 0 : i32
    %c0_i32_0 = arith.constant 0 : i32
    %c0_i32_1 = arith.constant 0 : i32
    return %c0_i32, %c0_i32_0 : i32, i32
  }
  func.func @transform_5(%arg0: i32) -> (i32, i32) {
    %c0_i32 = arith.constant 0 : i32
    %c0_i32_0 = arith.constant 0 : i32
    %c0_i32_1 = arith.constant 0 : i32
    return %c0_i32, %c0_i32_0 : i32, i32
  }
  func.func @transform_6(%arg0: i32) -> (i32, i32) {
    %c0_i32 = arith.constant 0 : i32
    %c0_i32_0 = arith.constant 0 : i32
    %c0_i32_1 = arith.constant 0 : i32
    return %c0_i32, %c0_i32_0 : i32, i32
  }
}

</mosaic_0001>

<bundles_post_ra>
// kernel: cal_forward.1
= control target key start
LH: loop header
LB: loop body
LE: loop exit
PB: predicated region body
PF: predicated region fallthrough
CT: control target
= control target key end

     0   :  { %vm30_vm0 = vcmask 261120   ;;  %v413_v8 = vmov 0   ;;  %v414_v44 = vmov 16.0   ;;  %s549_s0 = inlined_call_operand.vmem [shape: f32[16,32], index: 0, kind: input, shape index: {}]   ;;  %s550_s5 = inlined_call_operand.vmem [shape: f32[8,32], index: 5, kind: input, shape index: {}]   ;;  %s551_s3 = inlined_call_operand.vmem [shape: bf16[32,32], index: 3, kind: input, shape index: {}]   ;;  %s552_s4 = inlined_call_operand.vmem [shape: bf16[32,32], index: 4, kind: input, shape index: {}]   ;;  %s553_s1 = inlined_call_operand.vmem [shape: bf16[16,16], index: 1, kind: input, shape index: {}]   ;;  %s554_s2 = inlined_call_operand.vmem [shape: bf16[16,16], index: 2, kind: input, shape index: {}]   ;;  %s555_s6 = inlined_call_operand.vmem [shape: f32[16,128], index: 6, kind: output, shape index: {}]  }
   0x1   :  { %v453_v0 = vld [vmem:[%s549_s0] sm:$0xff]  ;;  %v465_v4 = vld [vmem:[%s549_s0 + $0x8] sm:$0xff]  ;;  %396 = vset.pattern.permute.xlu1 %v413_v8  ;;  %397 = vset.pattern.permute.xlu2 %v413_v8 }
   0x2   :  { %v458_v1 = vld [vmem:[%s550_s5] sm:$0xff]  ;;  %398 = vset.pattern.permute.xlu0 %v413_v8 }
   0x3   :  { %v27_v2 = vperm.slane %v458_v1, 6  ;;  %v37_v9 = vperm.slane %v458_v1, 7 }
   0x5   :  { %v28_v3 = vmul.f32 %v27_v2, %v453_v0  ;;  %v29_v6 = vmul.f32 %v27_v2, %v465_v4 }
   0x7   :  { %v31_v5 = vsel %vm30_vm0, %v28_v3, 0.0  ;;  %v34_v7 = vsel %vm30_vm0, %v29_v6, 0.0 }
   0x8   :  { %32 = vadd.xlane.f32.xlu0 %v31_v5 }
  0x10   :  { %35 = vadd.xlane.f32.xlu0 %v34_v7 }
  0x7b   :  { %v33_v10 = vpop.xlane.xlu0 %32 }
  0x7c   :  { %v38_v11 = vadd.f32 %v37_v9, %v33_v10 }
  0x7e   :  { %v40_v12 = vsub.f32 0.0, %v38_v11 }
  0x80   :  { %v42_v13 = vmul.f32 1.442695, %v40_v12 }
  0x82   :  { %399 = vpow2.f32 %v42_v13 }
  0x83   :  { %v36_v14 = vpop.xlane.xlu0 %35 }
  0x84   :  { %v39_v15 = vadd.f32 %v37_v9, %v36_v14 }
  0x86   :  { %v41_v16 = vsub.f32 0.0, %v39_v15 }
  0x88   :  { %v400_v17 = vpop.eup %399  ;;  %v44_v18 = vmul.f32 1.442695, %v41_v16 }
  0x89   :  { %v46_v19 = vadd.f32 1.0, %v400_v17 }
  0x8a   :  { %401 = vpow2.f32 %v44_v18 }
  0x8b   :  { %403 = vrcp.f32 %v46_v19  ;;  %v59_v25 = vand.u32 2147483648, %v46_v19  ;;  %v57_v27 = vand.u32 2147483647, %v46_v19  ;;  %vm53_vm2 = vweird.f32 %v46_v19 }
  0x8d   :  { %v60_v30 = vor.u32 1.1754944e-38, %v59_v25  ;;  %vm58_vm4 = vcmp.eq.f32.partialorder %v57_v27, 8.507059e+37 }
  0x90   :  { %v402_v20 = vpop.eup %401 }
  0x91   :  { %v404_v21 = vpop.eup %403  ;;  %v47_v22 = vadd.f32 1.0, %v402_v20 }
  0x92   :  { %v49_v23 = vmul.f32 %v404_v21, %v46_v19  ;;  %vm54_vm1 = vweird.f32 %v404_v21  ;;  %v389_v19 = vld [vmem:[%s551_s3 + $0x8] sm:$0xff] }
  0x93   :  { %405 = vrcp.f32 %v47_v22  ;;  %vm55_vm3 = vmor %vm53_vm2, %vm54_vm1  ;;  %v74_v36 = vand.u32 2147483648, %v47_v22  ;;  %v72_v38 = vand.u32 2147483647, %v47_v22  ;;  %vm68_vm6 = vweird.f32 %v47_v22  ;;  %170 = vmatpush.bf16.msra.mxu0 %v389_v19 }
  0x94   :  { %v50_v24 = vsub.f32 1.0, %v49_v23  ;;  %407 = vrcp.f32 %v414_v44  ;;  %v388_v23 = vld [vmem:[%s551_s3] sm:$0xff]  ;;  %vm185_vm1 = vcmask 130048  }
  0x95   :  { %v75_v40 = vor.u32 1.1754944e-38, %v74_v36  ;;  %vm73_vm8 = vcmp.eq.f32.partialorder %v72_v38, 8.507059e+37 }
  0x96   :  { %v51_v26 = vmul.f32 %v404_v21, %v50_v24 }
  0x97   :  { %171 = vmatpush.bf16.msra.mxu0 %v388_v23 }
  0x98   :  { %v52_v28 = vadd.f32 %v404_v21, %v51_v26 }
  0x99   :  { %v406_v29 = vpop.eup %405 }
  0x9a   :  { %v56_v31 = vsel %vm55_vm3, %v404_v21, %v52_v28  ;;  %v64_v32 = vmul.f32 %v406_v29, %v47_v22  ;;  %vm69_vm5 = vweird.f32 %v406_v29  ;;  %v408_v46 = vpop.eup %407 }
  0x9b   :  { %v61_v33 = vsel %vm58_vm4, %v60_v30, %v56_v31  ;;  %vm70_vm7 = vmor %vm68_vm6, %vm69_vm5  ;;  %v108_v48 = vmul.f32 16.0, %v408_v46  ;;  %vm112_vm9 = vweird.f32 %v408_v46 }
  0x9c   :  { %221 = vperm.xlu1 %396, %v61_v33   ;;  %v78_v34 = vsub.f32 1.0, %v61_v33  ;;  %v65_v35 = vsub.f32 1.0, %v64_v32 }
  0x9d   :  { %v109_v52 = vsub.f32 1.0, %v108_v48 }
  0x9e   :  { %88 = vperm.xlu2 %397, %v78_v34   ;;  %v66_v37 = vmul.f32 %v406_v29, %v65_v35 }
  0x9f   :  { %v110_v56 = vmul.f32 %v408_v46, %v109_v52 }
  0xa0   :  { %v67_v39 = vadd.f32 %v406_v29, %v66_v37 }
  0xa1   :  { %v111_v59 = vadd.f32 %v408_v46, %v110_v56 }
  0xa2   :  { %v71_v41 = vsel %vm70_vm7, %v406_v29, %v67_v39 }
  0xa3   :  { %v76_v42 = vsel %vm73_vm8, %v75_v40, %v71_v41  ;;  %v477_v63 = vsel %vm112_vm9, %v408_v46, %v111_v59  ;;  %v145_v59 = vperm.slane %v458_v1, 1 }
  0xa4   :  { %226 = vperm.xlu1 %396, %v76_v42   ;;  %v79_v43 = vsub.f32 1.0, %v76_v42 }
  0xa6   :  { %93 = vperm.xlu2 %397, %v79_v43   ;;  %v392_v43 = vld [vmem:[%s552_s4 + $0x8] sm:$0xff] }
  0xa7   :  { %296 = vmatpush.bf16.msra.mxu2 %v392_v43 }
  0xf8   :  { %v89_v45 = vpop.permute.xlu2 %88 }
  0xf9   :  { %v96_v47 = vmul.f32 %v89_v45, %v453_v0 }
  0xfb   :  { %v98_v51 = vsel %vm30_vm0, %v96_v47, 0.0 }
 0x100   :  { %v94_v49 = vpop.permute.xlu2 %93 }
 0x101   :  { %v97_v50 = vmul.f32 %v94_v49, %v465_v4 }
 0x103   :  { %v99_v53 = vsel %vm30_vm0, %v97_v50, 0.0 }
 0x104   :  { %v100_v54 = vadd.f32 %v99_v53, %v98_v51  ;;  %v142_v53 = vperm.slane %v458_v1, 0 }
 0x106   :  { %v101_v55 = vrot.slane %v100_v54, 4 }
 0x108   :  { %v102_v57 = vadd.f32 %v101_v55, %v100_v54 }
 0x10a   :  { %v103_v58 = vrot.slane %v102_v57, 2 }
 0x10c   :  { %v104_v60 = vadd.f32 %v103_v58, %v102_v57 }
 0x10e   :  { %v105_v61 = vrot.slane %v104_v60, 1  ;;  %v475_v62 = vpop.permute.xlu1 %221 }
 0x10f   :  { %v229_v7 = vmul.f32 %v475_v62, %v453_v0 }
 0x110   :  { %v106_v2 = vadd.f32 %v105_v61, %v104_v60 }
 0x111   :  { %v231_v15 = vsel %vm30_vm0, %v229_v7, 0.0 }
 0x112   :  { %v114_v3 = vmul.f32 %v477_v63, %v106_v2 }
 0x114   :  { %v480_v5 = vsub.f32 %v96_v47, %v114_v3  ;;  %v482_v6 = vsub.f32 %v97_v50, %v114_v3  ;;  %v391_v47 = vld [vmem:[%s552_s4] sm:$0xff] }
 0x115   :  { %297 = vmatpush.bf16.msra.mxu2 %v391_v47  ;;  %v340_v47 = vlaneseq }
 0x116   :  { %v117_v8 = vmul.f32 %v480_v5, %v480_v5  ;;  %v118_v9 = vmul.f32 %v482_v6, %v482_v6  ;;  %v490_v10 = vpop.permute.xlu1 %226 }
 0x117   :  { %v230_v11 = vmul.f32 %v490_v10, %v465_v4 }
 0x118   :  { %v119_v12 = vsel %vm30_vm0, %v117_v8, 0.0  ;;  %v120_v13 = vsel %vm30_vm0, %v118_v9, 0.0 }
 0x119   :  { %v121_v14 = vadd.f32 %v120_v13, %v119_v12  ;;  %v232_v0 = vsel %vm30_vm0, %v230_v11, 0.0 }
 0x11a   :  { %v233_v16 = vadd.f32 %v232_v0, %v231_v15 }
 0x11b   :  { %v122_v17 = vrot.slane %v121_v14, 4 }
 0x11c   :  { %v234_v18 = vrot.slane %v233_v16, 4 }
 0x11d   :  { %v123_v20 = vadd.f32 %v122_v17, %v121_v14 }
 0x11e   :  { %v235_v21 = vadd.f32 %v234_v18, %v233_v16  ;;  %v271_v16 = vperm.slane %v458_v1, 4 }
 0x11f   :  { %v124_v4 = vrot.slane %v123_v20, 2 }
 0x120   :  { %v236_v22 = vrot.slane %v235_v21, 2 }
 0x121   :  { %v125_v24 = vadd.f32 %v124_v4, %v123_v20 }
 0x122   :  { %v237_v25 = vadd.f32 %v236_v22, %v235_v21 }
 0x123   :  { %v126_v26 = vrot.slane %v125_v24, 1 }
 0x124   :  { %v238_v27 = vrot.slane %v237_v25, 1 }
 0x125   :  { %v127_v28 = vadd.f32 %v126_v26, %v125_v24  ;;  %v390_v24 = vld [vmem:[%s553_s1] sm:$0xff] }
 0x126   :  { %v239_v29 = vadd.f32 %v238_v27, %v237_v25 }
 0x127   :  { %v128_v30 = vmul.f32 %v127_v28, %v477_v63  ;;  %v393_v28 = vld [vmem:[%s554_s2] sm:$0xff] }
 0x128   :  { %v240_v31 = vmul.f32 %v239_v29, %v477_v63  ;;  %v179_v29 = vperm.slane %v458_v1, 2 }
 0x129   :  { %v129_v32 = vadd.f32 1e-05, %v128_v30 }
 0x12a   :  { %v241_v33 = vsub.f32 %v229_v7, %v240_v31  ;;  %v242_v34 = vsub.f32 %v230_v11, %v240_v31 }
 0x12b   :  { %409 = vrsqrt.f32 %v129_v32  ;;  %vm136_vm11 = vweird.f32 %v129_v32 }
 0x12c   :  { %v243_v35 = vmul.f32 %v241_v33, %v241_v33  ;;  %v244_v36 = vmul.f32 %v242_v34, %v242_v34 }
 0x12e   :  { %v245_v37 = vsel %vm30_vm0, %v243_v35, 0.0  ;;  %v246_v38 = vsel %vm30_vm0, %v244_v36, 0.0 }
 0x12f   :  { %v247_v39 = vadd.f32 %v246_v38, %v245_v37  ;;  %v305_v38 = vperm.slane %v458_v1, 5 }
 0x131   :  { %v410_v40 = vpop.eup %409  ;;  %v248_v41 = vrot.slane %v247_v39, 4 }
 0x132   :  { %v131_v42 = vmul.f32 %v410_v40, %v129_v32  ;;  %vm137_vm10 = vweird.f32 %v410_v40 }
 0x133   :  { %v249_v44 = vadd.f32 %v248_v41, %v247_v39  ;;  %vm138_vm12 = vmor %vm136_vm11, %vm137_vm10 }
 0x134   :  { %v132_v45 = vmul.f32 %v410_v40, %v131_v42 }
 0x135   :  { %v250_v46 = vrot.slane %v249_v44, 2 }
 0x136   :  { %v133_v48 = vmul.f32 0.5, %v132_v45 }
 0x137   :  { %v251_v49 = vadd.f32 %v250_v46, %v249_v44 }
 0x138   :  { %v134_v50 = vsub.f32 1.5, %v133_v48  ;;  %v341_v48 = vand.u32 127, %v340_v47 }
 0x139   :  { %v252_v51 = vrot.slane %v251_v49, 1 }
 0x13a   :  { %v135_v52 = vmul.f32 %v410_v40, %v134_v50  ;;  %vm342_vm2 = vcmp.eq.s32.totalorder %v341_v48, 0  ;;  %vm345_vm3 = vcmp.eq.s32.totalorder %v341_v48, 1  ;;  %vm348_vm4 = vcmp.eq.s32.totalorder %v341_v48, 2 }
 0x13b   :  { %v253_v54 = vadd.f32 %v252_v51, %v251_v49  ;;  %v343_v51 = vsel %vm342_vm2, %v475_v62, 0.0  ;;  %vm351_vm5 = vcmp.eq.s32.totalorder %v341_v48, 3 }
 0x13c   :  { %v139_v55 = vsel %vm138_vm12, %v410_v40, %v135_v52 }
 0x13d   :  { %v140_v56 = vmul.f32 %v139_v55, %v480_v5  ;;  %v141_v57 = vmul.f32 %v139_v55, %v482_v6  ;;  %v254_v58 = vmul.f32 %v253_v54, %v477_v63  ;;  %v268_v63 = vperm.slane %v458_v1, 3 }
 0x13f   :  { %v144_v60 = vmul.f32 %v142_v53, %v141_v57  ;;  %v255_v61 = vadd.f32 1e-05, %v254_v58  ;;  %v143_v2 = vmul.f32 %v142_v53, %v140_v56 }
 0x141   :  { %411 = vrsqrt.f32 %v255_v61  ;;  %v146_v3 = vadd.f32 %v145_v59, %v143_v2  ;;  %v147_v7 = vadd.f32 %v145_v59, %v144_v60  ;;  %vm262_vm14 = vweird.f32 %v255_v61 }
 0x142   :  { %v344_v60 = vsel %vm342_vm2, %v490_v10, 0.0 }
 0x143   :  { %v148_v8 = vpack.c.bf16 %v147_v7, %v146_v3 }
 0x145   :  { %368 = vmatmul.msk.bf16.vlgmr.msra.gmra.mxu0 %vm30_vm0, %v148_v8 }
 0x147   :  { %v412_v9 = vpop.eup %411 }
 0x148   :  { %v257_v11 = vmul.f32 %v412_v9, %v255_v61  ;;  %vm263_vm13 = vweird.f32 %v412_v9 }
 0x149   :  { %vm264_vm15 = vmor %vm262_vm14, %vm263_vm13 }
 0x14a   :  { %v258_v12 = vmul.f32 %v412_v9, %v257_v11 }
 0x14c   :  { %v259_v13 = vmul.f32 0.5, %v258_v12 }
 0x14e   :  { %v260_v5 = vsub.f32 1.5, %v259_v13 }
 0x150   :  { %v261_v6 = vmul.f32 %v412_v9, %v260_v5 }
 0x152   :  { %v265_v14 = vsel %vm264_vm15, %v412_v9, %v261_v6 }
 0x153   :  { %v266_v15 = vmul.f32 %v265_v14, %v241_v33  ;;  %v267_v0 = vmul.f32 %v265_v14, %v242_v34 }
 0x155   :  { %v270_v17 = vmul.f32 %v268_v63, %v267_v0  ;;  %v269_v18 = vmul.f32 %v268_v63, %v266_v15 }
 0x157   :  { %v272_v19 = vadd.f32 %v271_v16, %v269_v18  ;;  %v273_v20 = vadd.f32 %v271_v16, %v270_v17 }
 0x159   :  { %v274_v21 = vpack.c.bf16 %v273_v20, %v272_v19 }
 0x15b   :  { %382 = vmatmul.msk.bf16.vlgmr.msra.gmra.mxu2 %vm30_vm0, %v274_v21 }
 0x1c2   :  { %v173_v4 = vpop.f32.mrf.mxu0 }
 0x1ca   :  { %v175_v22 = vpop.f32.mrf.mxu0 }
 0x1cb   :  { %v178_v23 = vpack.c.bf16 %v175_v22, %v173_v4 }
 0x1cd   :  { %196 = vmatpush.bf16.msra.mxu1 %v178_v23 }
 0x1d0   :  { %373 = vmatmul.msk.bf16.vlgmr.msra.gmra.mxu1 %vm185_vm1, %v390_v24 }
 0x1de   :  { %v299_v25 = vpop.f32.mrf.mxu2 }
 0x1e6   :  { %v301_v26 = vpop.f32.mrf.mxu2 }
 0x1e7   :  { %v304_v27 = vpack.c.bf16 %v301_v26, %v299_v25 }
 0x1e9   :  { %321 = vmatpush.bf16.msra.mxu3 %v304_v27 }
 0x1ec   :  { %387 = vmatmul.msk.bf16.vlgmr.msra.gmra.mxu3 %vm185_vm1, %v393_v28 }
 0x24d   :  { %v198_v30 = vpop.f32.mrf.mxu1 }
 0x24e   :  { %v199_v31 = vadd.f32 %v198_v30, %v179_v29 }
 0x250   :  { %v203_v32 = vmax.f32 %v199_v31, 0.0 }
 0x252   :  { %v205_v33 = vsel %vm30_vm0, %v203_v32, 0.0 }
 0x253   :  { %206 = vadd.xlane.f32.xlu0 %v205_v33 }
 0x255   :  { %v200_v34 = vpop.f32.mrf.mxu1 }
 0x256   :  { %v201_v35 = vadd.f32 %v200_v34, %v179_v29 }
 0x258   :  { %v204_v36 = vmax.f32 %v201_v35, 0.0 }
 0x25a   :  { %v208_v37 = vsel %vm30_vm0, %v204_v36, 0.0 }
 0x25b   :  { %209 = vadd.xlane.f32.xlu1 %v208_v37 }
 0x26f   :  { %v323_v39 = vpop.f32.mrf.mxu3 }
 0x270   :  { %v324_v40 = vadd.f32 %v323_v39, %v305_v38 }
 0x272   :  { %v328_v41 = vmax.f32 %v324_v40, 0.0 }
 0x274   :  { %v330_v42 = vsel %vm30_vm0, %v328_v41, 0.0 }
 0x275   :  { %331 = vadd.xlane.f32.xlu2 %v330_v42 }
 0x277   :  { %v325_v43 = vpop.f32.mrf.mxu3 }
 0x278   :  { %v326_v44 = vadd.f32 %v325_v43, %v305_v38 }
 0x27a   :  { %v329_v45 = vmax.f32 %v326_v44, 0.0 }
 0x27c   :  { %v333_v46 = vsel %vm30_vm0, %v329_v45, 0.0 }
 0x27d   :  { %334 = vadd.xlane.f32.xlu0 %v333_v46 }
 0x2c6   :  { %v207_v49 = vpop.xlane.xlu0 %206 }
 0x2c7   :  { %v211_v50 = vmul.f32 0.03125, %v207_v49 }
 0x2c9   :  { %v346_v53 = vsel %vm345_vm3, %v211_v50, %v343_v51 }
 0x2ce   :  { %v210_v54 = vpop.xlane.xlu1 %209 }
 0x2cf   :  { %v212_v58 = vmul.f32 0.03125, %v210_v54 }
 0x2d1   :  { %v347_v62 = vsel %vm345_vm3, %v212_v58, %v344_v60 }
 0x2e8   :  { %v332_v1 = vpop.xlane.xlu2 %331 }
 0x2e9   :  { %v336_v52 = vmul.f32 0.03125, %v332_v1 }
 0x2eb   :  { %v338_v55 = vadd.f32 %v336_v52, %v211_v50  ;;  %v349_v56 = vsel %vm348_vm4, %v336_v52, %v346_v53 }
 0x2ed   :  { %v352_v57 = vsel %vm351_vm5, %v338_v55, %v349_v56 }
 0x2ee   :  { %354 = vst [vmem:[%s555_s6] sm:$0xff] %v352_v57 }
 0x2f0   :  { %v335_v59 = vpop.xlane.xlu0 %334 }
 0x2f1   :  { %v337_v61 = vmul.f32 0.03125, %v335_v59 }
 0x2f3   :  { %v339_v2 = vadd.f32 %v337_v61, %v212_v58  ;;  %v350_v3 = vsel %vm348_vm4, %v337_v61, %v347_v62 }
 0x2f5   :  { %v353_v7 = vsel %vm351_vm5, %v339_v2, %v350_v3 }
 0x2f6   :  { %355 = vst [vmem:[%s555_s6 + $0x8] sm:$0xff] %v353_v7 }

</bundles_post_ra>
